<compile_context>
chip_gen: v7x
topology: tpu7x:2x2x1
jax: 0.10.0
libtpu: 0.0.40
codegen_flags: <defaults>
</compile_context>

<pallas_src>
import functools

import jax
import jax.numpy as jnp
from jax.experimental import pallas as pl
from jax.experimental.pallas import tpu as pltpu

EPS = 1e-5                        # nn.GroupNorm default eps
MATMUL_DTYPE = jnp.float32        # set to jnp.bfloat16 on v5e for ~2x MXU rate
TOL = 1e-3 if MATMUL_DTYPE == jnp.float32 else 3e-2


def _round_up(v, m):
    return (v + m - 1) // m * m


def conv_block_kernel(x_ref, seg_ref, w1_ref, w2_ref, p_ref, o_ref, *,
                      Wp, n_spatial, B, SP):
    """One grid step processes B images folded into the lane axis.

    x_ref  : (1, Cpad, L), L = B*SP; zero at every padding lane (pad ring,
             lane tail, zero input channels).
    seg_ref: (B, L); seg[b, l] = 1.0 iff lane l is an interior pixel of image b.
    w1_ref : (9, Cout, Cpad)  per-tap conv1 weights (tap-major, padded Cin).
    w2_ref : (9, Cout, Cout)  per-tap conv2 weights.
    p_ref  : (2, Cout, 4)     [:, :, 0]=gamma, 1=beta, 2=PReLU slope.
    o_ref  : (1, Cout, L)
    """
    L = x_ref.shape[-1]
    seg = seg_ref[...].astype(jnp.float32)                   # (B, L)

    def conv3x3(inp, w_ref):
        # inp: (C, L) in MATMUL_DTYPE, zero at all padding lanes.
        # 9 accumulating dots; taps built with static XLU lane rotations.
        # Roll-wrap is safe: interior outputs never index past their own
        # image's zero pad ring (max |tap offset| = Wp+1 < SP - S interior
        # margin), so wrapped garbage lands only on pad/tail lanes.
        w = w_ref[...].astype(MATMUL_DTYPE)                   # (9, Cout, C)
        acc = None
        for t in range(9):
            ky, kx = divmod(t, 3)
            delta = (ky - 1) * Wp + (kx - 1)                  # flattened tap offset
            shift = (-delta) % L                              # jnp.roll convention
            tap = inp if shift == 0 else pltpu.roll(inp, shift, axis=1)
            part = jnp.dot(w[t], tap, preferred_element_type=jnp.float32)
            acc = part if acc is None else acc + part
        return acc                                            # (Cout, L) f32

    def gn_prelu(acc, params):
        # GroupNorm(num_groups=C): per-sample, per-channel stats over the H*W
        # interior of each image's SP segment.  Single pass (E[x^2] - mean^2);
        # fine at these magnitudes / eps=1e-5 (reference is two-pass).
        gamma = params[:, 0:1]                                # (Cout, 1)
        beta = params[:, 1:2]
        slope = params[:, 2:3]                                # shared PReLU slope
        a_full = None
        c_full = None
        for b in range(B):                                    # B rows of stats
            segb = seg[b:b + 1, :]                            # (1, L)
            am = acc * segb
            s1 = jnp.sum(am, axis=-1, keepdims=True)          # (Cout, 1)
            s2 = jnp.sum(am * acc, axis=-1, keepdims=True)    # sum x^2 on interior
            mean = s1 / n_spatial
            var = s2 / n_spatial - mean * mean
            a_b = jax.lax.rsqrt(var + EPS) * gamma            # (Cout, 1)
            c_b = beta - mean * a_b
            a_seg = a_b * segb                                # (Cout, L)
            c_seg = c_b * segb
            a_full = a_seg if a_full is None else a_full + a_seg
            c_full = c_seg if c_full is None else c_full + c_seg
        y = acc * a_full + c_full                             # == 0 on pad lanes
        return jnp.where(y > 0, y, slope * y)

    p = p_ref[...].astype(jnp.float32)                        # (2, Cout, 4)
    x = x_ref[0].astype(MATMUL_DTYPE)                         # (Cpad, L)

    # Conv biases omitted on purpose: GroupNorm(num_groups=C) immediately
    # follows each conv, so its per-channel mean subtraction cancels a
    # per-channel bias exactly.
    y = gn_prelu(conv3x3(x, w1_ref), p[0])                    # (Cout, L), 0 on pads
    z = gn_prelu(conv3x3(y.astype(MATMUL_DTYPE), w2_ref), p[1])

    # Lane-dense store (last dim L = multiple of 128); wrapper strips padding.
    o_ref[0] = z.astype(o_ref.dtype)


def conv_block(x_nchw, params):
    """x_nchw: (N, Cin, H, W) float32. params use PyTorch layouts (OIHW etc.)."""
    N, Cin, H, W = x_nchw.shape
    Cout = params["w1"].shape[0]
    Hp, Wp = H + 2, W + 2
    S = Hp * Wp
    SP = _round_up(S, 128)          # per-image flattened spatial, lane multiple
    Cpad = _round_up(Cin, 8)        # sublane-align Cin so rolled taps are 8-row slabs

    # Batch blocking: fold B images per grid step into the lane axis.  Grid
    # length 2 keeps both v7x TensorCores busy while halving serial steps on
    # v5e/v6e for larger batches.
    G = 2 if (N % 2 == 0) else N
    B = N // G
    L = B * SP
    # TODO(synk): for large H*W or large B, add a row-block grid axis with a
    # 1-row halo so the folded (C, L) working set stays inside v7x's 64 MiB VMEM.

    # ---- glue (plain JAX): zero-pad spatially + channels, flatten, fold batch ----
    x_pad = jnp.pad(x_nchw, ((0, 0), (0, Cpad - Cin), (1, 1), (1, 1)))
    x_flat = jnp.pad(x_pad.reshape(N, Cpad, S), ((0, 0), (0, 0), (0, SP - S)))
    x_fold = (x_flat.reshape(G, B, Cpad, SP)
              .transpose(0, 2, 1, 3)
              .reshape(G, Cpad, L))

    # per-sample interior indicator: seg[b, b*SP + s] = 1 iff s is a real pixel
    ys = jnp.arange(Hp)
    xs = jnp.arange(Wp)
    m2d = (((ys >= 1) & (ys <= H))[:, None] & ((xs >= 1) & (xs <= W))[None, :])
    m_flat = jnp.pad(m2d.reshape(S).astype(jnp.float32), (0, SP - S))       # (SP,)
    seg = (jnp.eye(B, dtype=jnp.float32)[:, :, None] * m_flat[None, None, :]
           ).reshape(B, L)

    # weights: OIHW -> (Ky, Kx, Cout, Cin) -> (9, Cout, Cin) -> pad Cin to Cpad
    def tapify(w, cin, cpad):
        wt = jnp.transpose(w, (2, 3, 0, 1)).reshape(9, Cout, cin)
        return jnp.pad(wt, ((0, 0), (0, 0), (0, cpad - cin))).astype(MATMUL_DTYPE)

    w1t = tapify(params["w1"], Cin, Cpad)           # (9, Cout, Cpad)
    w2t = tapify(params["w2"], Cout, Cout)          # (9, Cout, Cout)

    # pack the tiny per-stage params into one resident operand: gamma, beta, slope
    def pack(g, be, a):
        return jnp.stack([g.reshape(Cout),
                          be.reshape(Cout),
                          jnp.full((Cout,), a.reshape(())),
                          jnp.zeros((Cout,))], axis=-1).astype(jnp.float32)

    p = jnp.stack([pack(params["g1"], params["be1"], params["a1"]),
                   pack(params["g2"], params["be2"], params["a2"])], axis=0)

    kernel = functools.partial(conv_block_kernel, Wp=Wp,
                               n_spatial=float(H * W), B=B, SP=SP)

    def resident(shape):
        nd = len(shape)
        return pl.BlockSpec(shape, lambda g, _nd=nd: (0,) * _nd)

    out_fold = pl.pallas_call(
        kernel,
        out_shape=jax.ShapeDtypeStruct((G, Cout, L), x_nchw.dtype),
        grid_spec=pltpu.PrefetchScalarGridSpec(
            num_scalar_prefetch=0,
            grid=(G,),
            in_specs=[
                pl.BlockSpec((1, Cpad, L), lambda g: (g, 0, 0)),  # folded batch block
                resident((B, L)),                                  # per-sample masks
                resident((9, Cout, Cpad)),                         # conv1 per-tap weights
                resident((9, Cout, Cout)),                         # conv2 per-tap weights
                resident((2, Cout, 4)),                            # gamma/beta/slope
            ],
            out_specs=pl.BlockSpec((1, Cout, L), lambda g: (g, 0, 0)),
        ),
        compiler_params=pltpu.CompilerParams(
            dimension_semantics=("parallel",)),                    # batch blocks over TCs
    )(x_fold, seg, w1t, w2t, p)

    # glue: unfold batch, drop lane padding + the 1-wide spatial border
    out = (out_fold.reshape(G, Cout, B, SP)
           .transpose(0, 2, 1, 3)
           .reshape(N, Cout, SP)[:, :, :S]
           .reshape(N, Cout, Hp, Wp)[:, :, 1:H + 1, 1:W + 1])
    return out


def ref_conv_block(x, p):
    """Pure-JAX reference with exact PyTorch semantics (NCHW, with biases)."""
    def conv(x, w, b):
        y = jax.lax.conv_general_dilated(
            x, w, (1, 1), ((1, 1), (1, 1)),
            dimension_numbers=("NCHW", "OIHW", "NCHW"))
        return y + b.reshape(1, -1, 1, 1)

    def gn_prelu(y, g, be, a):
        mean = jnp.mean(y, axis=(2, 3), keepdims=True)
        var = jnp.mean((y - mean) ** 2, axis=(2, 3), keepdims=True)
        yn = (y - mean) * jax.lax.rsqrt(var + EPS)
        yn = yn * g.reshape(1, -1, 1, 1) + be.reshape(1, -1, 1, 1)
        return jnp.where(yn > 0, yn, a * yn)

    y = gn_prelu(conv(x, p["w1"], p["b1"]), p["g1"], p["be1"], p["a1"][0, 0])
    y = gn_prelu(conv(y, p["w2"], p["b2"]), p["g2"], p["be2"], p["a2"][0, 0])
    return y


if __name__ == "__main__":
    N, Cin, H, W, Cout = 2, 4, 16, 16, 8

    key = jax.random.PRNGKey(0)
    ks = jax.random.split(key, 9)

    # Deterministic synthetic parameters in PyTorch-native layouts.
    params = {
        "w1": 0.3 * jax.random.normal(ks[1], (Cout, Cin, 3, 3), jnp.float32),
        "b1": 0.1 * jax.random.normal(ks[2], (Cout,), jnp.float32),
        "g1": 1.0 + 0.05 * jax.random.normal(ks[3], (Cout,), jnp.float32),
        "be1": 0.05 * jax.random.normal(ks[4], (Cout,), jnp.float32),
        "a1": jnp.full((1, 1), 0.25, jnp.float32),   # PReLU default init
        "w2": 0.3 * jax.random.normal(ks[5], (Cout, Cout, 3, 3), jnp.float32),
        "b2": 0.1 * jax.random.normal(ks[6], (Cout,), jnp.float32),
        "g2": 1.0 + 0.05 * jax.random.normal(ks[7], (Cout,), jnp.float32),
        "be2": 0.05 * jax.random.normal(ks[8], (Cout,), jnp.float32),
        "a2": jnp.full((1, 1), 0.25, jnp.float32),
    }

    # PyTorch-style NCHW input (kernel wrapper consumes NCHW directly).
    x_nchw = jax.random.normal(ks[0], (N, Cin, H, W), jnp.float32)

    out = conv_block(x_nchw, params)
    jax.block_until_ready(out)

    ref = ref_conv_block(x_nchw, params)
    assert out.shape == (N, Cout, H, W)
    err = float(jnp.max(jnp.abs(out - ref)))
    assert err < TOL, f"max abs err {err}"

    print("KERNEL_OK")
</pallas_src>

<mosaic_0001>
module attributes {stable_mosaic.version = 11 : i64} {
  func.func @conv_block_kernel(%arg0: i32, %arg1: memref<1x8x384xf32, #tpu.memory_space<vmem>>, %arg2: memref<1x384xf32, #tpu.memory_space<vmem>>, %arg3: memref<9x8x8xf32, #tpu.memory_space<vmem>>, %arg4: memref<9x8x8xf32, #tpu.memory_space<vmem>>, %arg5: memref<2x8x4xf32, #tpu.memory_space<vmem>>, %arg6: memref<1x8x384xf32, #tpu.memory_space<vmem>>) attributes {dimension_semantics = [#tpu.dimension_semantics<parallel>], iteration_bounds = array<i64: 2>, scalar_prefetch = 0 : i64, scratch_operands = 0 : i64, tpu.core_type = #tpu.core_type<tc>, window_params = [{transform_indices = @transform_0, window_bounds = array<i64: 1, 8, 384>}, {pipeline_mode = #tpu.pipeline_mode<synchronous>, transform_indices = @transform_1, window_bounds = array<i64: 1, 384>}, {pipeline_mode = #tpu.pipeline_mode<synchronous>, transform_indices = @transform_2, window_bounds = array<i64: 9, 8, 8>}, {pipeline_mode = #tpu.pipeline_mode<synchronous>, transform_indices = @transform_3, window_bounds = array<i64: 9, 8, 8>}, {pipeline_mode = #tpu.pipeline_mode<synchronous>, transform_indices = @transform_4, window_bounds = array<i64: 2, 8, 4>}, {transform_indices = @transform_5, window_bounds = array<i64: 1, 8, 384>}]} {
    %c0 = arith.constant 0 : index
    %c0_0 = arith.constant 0 : index
    %0 = vector.load %arg2[%c0, %c0_0] : memref<1x384xf32, #tpu.memory_space<vmem>>, vector<1x384xf32>
    %c0_1 = arith.constant 0 : index
    %c0_2 = arith.constant 0 : index
    %c0_3 = arith.constant 0 : index
    %1 = vector.load %arg5[%c0_1, %c0_2, %c0_3] : memref<2x8x4xf32, #tpu.memory_space<vmem>>, vector<2x8x4xf32>
    %c0_4 = arith.constant 0 : index
    %c0_5 = arith.constant 0 : index
    %c0_6 = arith.constant 0 : index
    %2 = vector.load %arg1[%c0_4, %c0_5, %c0_6] : memref<1x8x384xf32, #tpu.memory_space<vmem>>, vector<1x8x384xf32>
    %3 = vector.shape_cast %2 : vector<1x8x384xf32> to vector<8x384xf32>
    %c0_7 = arith.constant 0 : index
    %c0_8 = arith.constant 0 : index
    %c0_9 = arith.constant 0 : index
    %4 = vector.load %arg3[%c0_7, %c0_8, %c0_9] : memref<9x8x8xf32, #tpu.memory_space<vmem>>, vector<9x8x8xf32>
    %c19_i32 = arith.constant 19 : i32
    %5 = tpu.dynamic_rotate %3 by %c19_i32 dim 1 : vector<8x384xf32>, i32 -> vector<8x384xf32>
    %6 = vector.extract_strided_slice %4 {offsets = [0, 0, 0], sizes = [1, 8, 8], strides = [1, 1, 1]} : vector<9x8x8xf32> to vector<1x8x8xf32>
    %7 = vector.shape_cast %6 : vector<1x8x8xf32> to vector<8x8xf32>
    %cst = arith.constant dense<0.000000e+00> : vector<8x384xf32>
    %8 = tpu.matmul %7, %5, %cst {dimension_numbers = #tpu.dot_dimension_numbers<[1], [0], [0], [1], [0, 0, 1, 1], [], []>} : vector<8x8xf32>, vector<8x384xf32>, vector<8x384xf32> -> vector<8x384xf32>
    %c18_i32 = arith.constant 18 : i32
    %9 = tpu.dynamic_rotate %3 by %c18_i32 dim 1 : vector<8x384xf32>, i32 -> vector<8x384xf32>
    %10 = vector.extract_strided_slice %4 {offsets = [1, 0, 0], sizes = [1, 8, 8], strides = [1, 1, 1]} : vector<9x8x8xf32> to vector<1x8x8xf32>
    %11 = vector.shape_cast %10 : vector<1x8x8xf32> to vector<8x8xf32>
    %cst_10 = arith.constant dense<0.000000e+00> : vector<8x384xf32>
    %12 = tpu.matmul %11, %9, %cst_10 {dimension_numbers = #tpu.dot_dimension_numbers<[1], [0], [0], [1], [0, 0, 1, 1], [], []>} : vector<8x8xf32>, vector<8x384xf32>, vector<8x384xf32> -> vector<8x384xf32>
    %13 = arith.addf %8, %12 : vector<8x384xf32>
    %c17_i32 = arith.constant 17 : i32
    %14 = tpu.dynamic_rotate %3 by %c17_i32 dim 1 : vector<8x384xf32>, i32 -> vector<8x384xf32>
    %15 = vector.extract_strided_slice %4 {offsets = [2, 0, 0], sizes = [1, 8, 8], strides = [1, 1, 1]} : vector<9x8x8xf32> to vector<1x8x8xf32>
    %16 = vector.shape_cast %15 : vector<1x8x8xf32> to vector<8x8xf32>
    %cst_11 = arith.constant dense<0.000000e+00> : vector<8x384xf32>
    %17 = tpu.matmul %16, %14, %cst_11 {dimension_numbers = #tpu.dot_dimension_numbers<[1], [0], [0], [1], [0, 0, 1, 1], [], []>} : vector<8x8xf32>, vector<8x384xf32>, vector<8x384xf32> -> vector<8x384xf32>
    %18 = arith.addf %13, %17 : vector<8x384xf32>
    %c1_i32 = arith.constant 1 : i32
    %19 = tpu.dynamic_rotate %3 by %c1_i32 dim 1 : vector<8x384xf32>, i32 -> vector<8x384xf32>
    %20 = vector.extract_strided_slice %4 {offsets = [3, 0, 0], sizes = [1, 8, 8], strides = [1, 1, 1]} : vector<9x8x8xf32> to vector<1x8x8xf32>
    %21 = vector.shape_cast %20 : vector<1x8x8xf32> to vector<8x8xf32>
    %cst_12 = arith.constant dense<0.000000e+00> : vector<8x384xf32>
    %22 = tpu.matmul %21, %19, %cst_12 {dimension_numbers = #tpu.dot_dimension_numbers<[1], [0], [0], [1], [0, 0, 1, 1], [], []>} : vector<8x8xf32>, vector<8x384xf32>, vector<8x384xf32> -> vector<8x384xf32>
    %23 = arith.addf %18, %22 : vector<8x384xf32>
    %24 = vector.extract_strided_slice %4 {offsets = [4, 0, 0], sizes = [1, 8, 8], strides = [1, 1, 1]} : vector<9x8x8xf32> to vector<1x8x8xf32>
    %25 = vector.shape_cast %24 : vector<1x8x8xf32> to vector<8x8xf32>
    %cst_13 = arith.constant dense<0.000000e+00> : vector<8x384xf32>
    %26 = tpu.matmul %25, %3, %cst_13 {dimension_numbers = #tpu.dot_dimension_numbers<[1], [0], [0], [1], [0, 0, 1, 1], [], []>} : vector<8x8xf32>, vector<8x384xf32>, vector<8x384xf32> -> vector<8x384xf32>
    %27 = arith.addf %23, %26 : vector<8x384xf32>
    %c383_i32 = arith.constant 383 : i32
    %28 = tpu.dynamic_rotate %3 by %c383_i32 dim 1 : vector<8x384xf32>, i32 -> vector<8x384xf32>
    %29 = vector.extract_strided_slice %4 {offsets = [5, 0, 0], sizes = [1, 8, 8], strides = [1, 1, 1]} : vector<9x8x8xf32> to vector<1x8x8xf32>
    %30 = vector.shape_cast %29 : vector<1x8x8xf32> to vector<8x8xf32>
    %cst_14 = arith.constant dense<0.000000e+00> : vector<8x384xf32>
    %31 = tpu.matmul %30, %28, %cst_14 {dimension_numbers = #tpu.dot_dimension_numbers<[1], [0], [0], [1], [0, 0, 1, 1], [], []>} : vector<8x8xf32>, vector<8x384xf32>, vector<8x384xf32> -> vector<8x384xf32>
    %32 = arith.addf %27, %31 : vector<8x384xf32>
    %c367_i32 = arith.constant 367 : i32
    %33 = tpu.dynamic_rotate %3 by %c367_i32 dim 1 : vector<8x384xf32>, i32 -> vector<8x384xf32>
    %34 = vector.extract_strided_slice %4 {offsets = [6, 0, 0], sizes = [1, 8, 8], strides = [1, 1, 1]} : vector<9x8x8xf32> to vector<1x8x8xf32>
    %35 = vector.shape_cast %34 : vector<1x8x8xf32> to vector<8x8xf32>
    %cst_15 = arith.constant dense<0.000000e+00> : vector<8x384xf32>
    %36 = tpu.matmul %35, %33, %cst_15 {dimension_numbers = #tpu.dot_dimension_numbers<[1], [0], [0], [1], [0, 0, 1, 1], [], []>} : vector<8x8xf32>, vector<8x384xf32>, vector<8x384xf32> -> vector<8x384xf32>
    %37 = arith.addf %32, %36 : vector<8x384xf32>
    %c366_i32 = arith.constant 366 : i32
    %38 = tpu.dynamic_rotate %3 by %c366_i32 dim 1 : vector<8x384xf32>, i32 -> vector<8x384xf32>
    %39 = vector.extract_strided_slice %4 {offsets = [7, 0, 0], sizes = [1, 8, 8], strides = [1, 1, 1]} : vector<9x8x8xf32> to vector<1x8x8xf32>
    %40 = vector.shape_cast %39 : vector<1x8x8xf32> to vector<8x8xf32>
    %cst_16 = arith.constant dense<0.000000e+00> : vector<8x384xf32>
    %41 = tpu.matmul %40, %38, %cst_16 {dimension_numbers = #tpu.dot_dimension_numbers<[1], [0], [0], [1], [0, 0, 1, 1], [], []>} : vector<8x8xf32>, vector<8x384xf32>, vector<8x384xf32> -> vector<8x384xf32>
    %42 = arith.addf %37, %41 : vector<8x384xf32>
    %c365_i32 = arith.constant 365 : i32
    %43 = tpu.dynamic_rotate %3 by %c365_i32 dim 1 : vector<8x384xf32>, i32 -> vector<8x384xf32>
    %44 = vector.extract_strided_slice %4 {offsets = [8, 0, 0], sizes = [1, 8, 8], strides = [1, 1, 1]} : vector<9x8x8xf32> to vector<1x8x8xf32>
    %45 = vector.shape_cast %44 : vector<1x8x8xf32> to vector<8x8xf32>
    %cst_17 = arith.constant dense<0.000000e+00> : vector<8x384xf32>
    %46 = tpu.matmul %45, %43, %cst_17 {dimension_numbers = #tpu.dot_dimension_numbers<[1], [0], [0], [1], [0, 0, 1, 1], [], []>} : vector<8x8xf32>, vector<8x384xf32>, vector<8x384xf32> -> vector<8x384xf32>
    %47 = arith.addf %42, %46 : vector<8x384xf32>
    %48 = vector.extract_strided_slice %1 {offsets = [0, 0, 0], sizes = [1, 8, 4], strides = [1, 1, 1]} : vector<2x8x4xf32> to vector<1x8x4xf32>
    %49 = vector.shape_cast %48 : vector<1x8x4xf32> to vector<8x4xf32>
    %50 = vector.extract_strided_slice %49 {offsets = [0, 0], sizes = [8, 1], strides = [1, 1]} : vector<8x4xf32> to vector<8x1xf32>
    %51 = vector.extract_strided_slice %49 {offsets = [0, 1], sizes = [8, 1], strides = [1, 1]} : vector<8x4xf32> to vector<8x1xf32>
    %52 = vector.extract_strided_slice %49 {offsets = [0, 2], sizes = [8, 1], strides = [1, 1]} : vector<8x4xf32> to vector<8x1xf32>
    %53 = vector.broadcast %0 : vector<1x384xf32> to vector<8x384xf32>
    %54 = arith.mulf %47, %53 : vector<8x384xf32>
    %cst_18 = arith.constant dense<0.000000e+00> : vector<8xf32>
    %55 = vector.multi_reduction <add>, %54, %cst_18 [1] : vector<8x384xf32> to vector<8xf32>
    %56 = vector.shape_cast %55 : vector<8xf32> to vector<8x1xf32>
    %57 = arith.mulf %54, %47 : vector<8x384xf32>
    %cst_19 = arith.constant dense<0.000000e+00> : vector<8xf32>
    %58 = vector.multi_reduction <add>, %57, %cst_19 [1] : vector<8x384xf32> to vector<8xf32>
    %59 = vector.shape_cast %58 : vector<8xf32> to vector<8x1xf32>
    %cst_20 = arith.constant 2.560000e+02 : f32
    %60 = vector.broadcast %cst_20 : f32 to vector<8x1xf32>
    %61 = arith.divf %56, %60 : vector<8x1xf32>
    %cst_21 = arith.constant 2.560000e+02 : f32
    %62 = vector.broadcast %cst_21 : f32 to vector<8x1xf32>
    %63 = arith.divf %59, %62 : vector<8x1xf32>
    %64 = arith.mulf %61, %61 : vector<8x1xf32>
    %65 = arith.subf %63, %64 : vector<8x1xf32>
    %cst_22 = arith.constant 9.99999974E-6 : f32
    %66 = vector.broadcast %cst_22 : f32 to vector<8x1xf32>
    %67 = arith.addf %65, %66 : vector<8x1xf32>
    %68 = math.rsqrt %67 : vector<8x1xf32>
    %69 = arith.mulf %68, %50 : vector<8x1xf32>
    %70 = arith.mulf %61, %69 : vector<8x1xf32>
    %71 = arith.subf %51, %70 : vector<8x1xf32>
    %72 = vector.broadcast %69 : vector<8x1xf32> to vector<8x384xf32>
    %73 = vector.broadcast %0 : vector<1x384xf32> to vector<8x384xf32>
    %74 = arith.mulf %72, %73 : vector<8x384xf32>
    %75 = vector.broadcast %71 : vector<8x1xf32> to vector<8x384xf32>
    %76 = vector.broadcast %0 : vector<1x384xf32> to vector<8x384xf32>
    %77 = arith.mulf %75, %76 : vector<8x384xf32>
    %78 = arith.mulf %47, %74 : vector<8x384xf32>
    %79 = arith.addf %78, %77 : vector<8x384xf32>
    %cst_23 = arith.constant 0.000000e+00 : f32
    %80 = vector.broadcast %cst_23 : f32 to vector<8x384xf32>
    %81 = arith.cmpf ogt, %79, %80 : vector<8x384xf32>
    %82 = vector.broadcast %52 : vector<8x1xf32> to vector<8x384xf32>
    %83 = arith.mulf %82, %79 : vector<8x384xf32>
    %84 = arith.select %81, %79, %83 : vector<8x384xi1>, vector<8x384xf32>
    %c0_24 = arith.constant 0 : index
    %c0_25 = arith.constant 0 : index
    %c0_26 = arith.constant 0 : index
    %85 = vector.load %arg4[%c0_24, %c0_25, %c0_26] : memref<9x8x8xf32, #tpu.memory_space<vmem>>, vector<9x8x8xf32>
    %c19_i32_27 = arith.constant 19 : i32
    %86 = tpu.dynamic_rotate %84 by %c19_i32_27 dim 1 : vector<8x384xf32>, i32 -> vector<8x384xf32>
    %87 = vector.extract_strided_slice %85 {offsets = [0, 0, 0], sizes = [1, 8, 8], strides = [1, 1, 1]} : vector<9x8x8xf32> to vector<1x8x8xf32>
    %88 = vector.shape_cast %87 : vector<1x8x8xf32> to vector<8x8xf32>
    %cst_28 = arith.constant dense<0.000000e+00> : vector<8x384xf32>
    %89 = tpu.matmul %88, %86, %cst_28 {dimension_numbers = #tpu.dot_dimension_numbers<[1], [0], [0], [1], [0, 0, 1, 1], [], []>} : vector<8x8xf32>, vector<8x384xf32>, vector<8x384xf32> -> vector<8x384xf32>
    %c18_i32_29 = arith.constant 18 : i32
    %90 = tpu.dynamic_rotate %84 by %c18_i32_29 dim 1 : vector<8x384xf32>, i32 -> vector<8x384xf32>
    %91 = vector.extract_strided_slice %85 {offsets = [1, 0, 0], sizes = [1, 8, 8], strides = [1, 1, 1]} : vector<9x8x8xf32> to vector<1x8x8xf32>
    %92 = vector.shape_cast %91 : vector<1x8x8xf32> to vector<8x8xf32>
    %cst_30 = arith.constant dense<0.000000e+00> : vector<8x384xf32>
    %93 = tpu.matmul %92, %90, %cst_30 {dimension_numbers = #tpu.dot_dimension_numbers<[1], [0], [0], [1], [0, 0, 1, 1], [], []>} : vector<8x8xf32>, vector<8x384xf32>, vector<8x384xf32> -> vector<8x384xf32>
    %94 = arith.addf %89, %93 : vector<8x384xf32>
    %c17_i32_31 = arith.constant 17 : i32
    %95 = tpu.dynamic_rotate %84 by %c17_i32_31 dim 1 : vector<8x384xf32>, i32 -> vector<8x384xf32>
    %96 = vector.extract_strided_slice %85 {offsets = [2, 0, 0], sizes = [1, 8, 8], strides = [1, 1, 1]} : vector<9x8x8xf32> to vector<1x8x8xf32>
    %97 = vector.shape_cast %96 : vector<1x8x8xf32> to vector<8x8xf32>
    %cst_32 = arith.constant dense<0.000000e+00> : vector<8x384xf32>
    %98 = tpu.matmul %97, %95, %cst_32 {dimension_numbers = #tpu.dot_dimension_numbers<[1], [0], [0], [1], [0, 0, 1, 1], [], []>} : vector<8x8xf32>, vector<8x384xf32>, vector<8x384xf32> -> vector<8x384xf32>
    %99 = arith.addf %94, %98 : vector<8x384xf32>
    %c1_i32_33 = arith.constant 1 : i32
    %100 = tpu.dynamic_rotate %84 by %c1_i32_33 dim 1 : vector<8x384xf32>, i32 -> vector<8x384xf32>
    %101 = vector.extract_strided_slice %85 {offsets = [3, 0, 0], sizes = [1, 8, 8], strides = [1, 1, 1]} : vector<9x8x8xf32> to vector<1x8x8xf32>
    %102 = vector.shape_cast %101 : vector<1x8x8xf32> to vector<8x8xf32>
    %cst_34 = arith.constant dense<0.000000e+00> : vector<8x384xf32>
    %103 = tpu.matmul %102, %100, %cst_34 {dimension_numbers = #tpu.dot_dimension_numbers<[1], [0], [0], [1], [0, 0, 1, 1], [], []>} : vector<8x8xf32>, vector<8x384xf32>, vector<8x384xf32> -> vector<8x384xf32>
    %104 = arith.addf %99, %103 : vector<8x384xf32>
    %105 = vector.extract_strided_slice %85 {offsets = [4, 0, 0], sizes = [1, 8, 8], strides = [1, 1, 1]} : vector<9x8x8xf32> to vector<1x8x8xf32>
    %106 = vector.shape_cast %105 : vector<1x8x8xf32> to vector<8x8xf32>
    %cst_35 = arith.constant dense<0.000000e+00> : vector<8x384xf32>
    %107 = tpu.matmul %106, %84, %cst_35 {dimension_numbers = #tpu.dot_dimension_numbers<[1], [0], [0], [1], [0, 0, 1, 1], [], []>} : vector<8x8xf32>, vector<8x384xf32>, vector<8x384xf32> -> vector<8x384xf32>
    %108 = arith.addf %104, %107 : vector<8x384xf32>
    %c383_i32_36 = arith.constant 383 : i32
    %109 = tpu.dynamic_rotate %84 by %c383_i32_36 dim 1 : vector<8x384xf32>, i32 -> vector<8x384xf32>
    %110 = vector.extract_strided_slice %85 {offsets = [5, 0, 0], sizes = [1, 8, 8], strides = [1, 1, 1]} : vector<9x8x8xf32> to vector<1x8x8xf32>
    %111 = vector.shape_cast %110 : vector<1x8x8xf32> to vector<8x8xf32>
    %cst_37 = arith.constant dense<0.000000e+00> : vector<8x384xf32>
    %112 = tpu.matmul %111, %109, %cst_37 {dimension_numbers = #tpu.dot_dimension_numbers<[1], [0], [0], [1], [0, 0, 1, 1], [], []>} : vector<8x8xf32>, vector<8x384xf32>, vector<8x384xf32> -> vector<8x384xf32>
    %113 = arith.addf %108, %112 : vector<8x384xf32>
    %c367_i32_38 = arith.constant 367 : i32
    %114 = tpu.dynamic_rotate %84 by %c367_i32_38 dim 1 : vector<8x384xf32>, i32 -> vector<8x384xf32>
    %115 = vector.extract_strided_slice %85 {offsets = [6, 0, 0], sizes = [1, 8, 8], strides = [1, 1, 1]} : vector<9x8x8xf32> to vector<1x8x8xf32>
    %116 = vector.shape_cast %115 : vector<1x8x8xf32> to vector<8x8xf32>
    %cst_39 = arith.constant dense<0.000000e+00> : vector<8x384xf32>
    %117 = tpu.matmul %116, %114, %cst_39 {dimension_numbers = #tpu.dot_dimension_numbers<[1], [0], [0], [1], [0, 0, 1, 1], [], []>} : vector<8x8xf32>, vector<8x384xf32>, vector<8x384xf32> -> vector<8x384xf32>
    %118 = arith.addf %113, %117 : vector<8x384xf32>
    %c366_i32_40 = arith.constant 366 : i32
    %119 = tpu.dynamic_rotate %84 by %c366_i32_40 dim 1 : vector<8x384xf32>, i32 -> vector<8x384xf32>
    %120 = vector.extract_strided_slice %85 {offsets = [7, 0, 0], sizes = [1, 8, 8], strides = [1, 1, 1]} : vector<9x8x8xf32> to vector<1x8x8xf32>
    %121 = vector.shape_cast %120 : vector<1x8x8xf32> to vector<8x8xf32>
    %cst_41 = arith.constant dense<0.000000e+00> : vector<8x384xf32>
    %122 = tpu.matmul %121, %119, %cst_41 {dimension_numbers = #tpu.dot_dimension_numbers<[1], [0], [0], [1], [0, 0, 1, 1], [], []>} : vector<8x8xf32>, vector<8x384xf32>, vector<8x384xf32> -> vector<8x384xf32>
    %123 = arith.addf %118, %122 : vector<8x384xf32>
    %c365_i32_42 = arith.constant 365 : i32
    %124 = tpu.dynamic_rotate %84 by %c365_i32_42 dim 1 : vector<8x384xf32>, i32 -> vector<8x384xf32>
    %125 = vector.extract_strided_slice %85 {offsets = [8, 0, 0], sizes = [1, 8, 8], strides = [1, 1, 1]} : vector<9x8x8xf32> to vector<1x8x8xf32>
    %126 = vector.shape_cast %125 : vector<1x8x8xf32> to vector<8x8xf32>
    %cst_43 = arith.constant dense<0.000000e+00> : vector<8x384xf32>
    %127 = tpu.matmul %126, %124, %cst_43 {dimension_numbers = #tpu.dot_dimension_numbers<[1], [0], [0], [1], [0, 0, 1, 1], [], []>} : vector<8x8xf32>, vector<8x384xf32>, vector<8x384xf32> -> vector<8x384xf32>
    %128 = arith.addf %123, %127 : vector<8x384xf32>
    %129 = vector.extract_strided_slice %1 {offsets = [1, 0, 0], sizes = [1, 8, 4], strides = [1, 1, 1]} : vector<2x8x4xf32> to vector<1x8x4xf32>
    %130 = vector.shape_cast %129 : vector<1x8x4xf32> to vector<8x4xf32>
    %131 = vector.extract_strided_slice %130 {offsets = [0, 0], sizes = [8, 1], strides = [1, 1]} : vector<8x4xf32> to vector<8x1xf32>
    %132 = vector.extract_strided_slice %130 {offsets = [0, 1], sizes = [8, 1], strides = [1, 1]} : vector<8x4xf32> to vector<8x1xf32>
    %133 = vector.extract_strided_slice %130 {offsets = [0, 2], sizes = [8, 1], strides = [1, 1]} : vector<8x4xf32> to vector<8x1xf32>
    %134 = vector.broadcast %0 : vector<1x384xf32> to vector<8x384xf32>
    %135 = arith.mulf %128, %134 : vector<8x384xf32>
    %cst_44 = arith.constant dense<0.000000e+00> : vector<8xf32>
    %136 = vector.multi_reduction <add>, %135, %cst_44 [1] : vector<8x384xf32> to vector<8xf32>
    %137 = vector.shape_cast %136 : vector<8xf32> to vector<8x1xf32>
    %138 = arith.mulf %135, %128 : vector<8x384xf32>
    %cst_45 = arith.constant dense<0.000000e+00> : vector<8xf32>
    %139 = vector.multi_reduction <add>, %138, %cst_45 [1] : vector<8x384xf32> to vector<8xf32>
    %140 = vector.shape_cast %139 : vector<8xf32> to vector<8x1xf32>
    %cst_46 = arith.constant 2.560000e+02 : f32
    %141 = vector.broadcast %cst_46 : f32 to vector<8x1xf32>
    %142 = arith.divf %137, %141 : vector<8x1xf32>
    %cst_47 = arith.constant 2.560000e+02 : f32
    %143 = vector.broadcast %cst_47 : f32 to vector<8x1xf32>
    %144 = arith.divf %140, %143 : vector<8x1xf32>
    %145 = arith.mulf %142, %142 : vector<8x1xf32>
    %146 = arith.subf %144, %145 : vector<8x1xf32>
    %cst_48 = arith.constant 9.99999974E-6 : f32
    %147 = vector.broadcast %cst_48 : f32 to vector<8x1xf32>
    %148 = arith.addf %146, %147 : vector<8x1xf32>
    %149 = math.rsqrt %148 : vector<8x1xf32>
    %150 = arith.mulf %149, %131 : vector<8x1xf32>
    %151 = arith.mulf %142, %150 : vector<8x1xf32>
    %152 = arith.subf %132, %151 : vector<8x1xf32>
    %153 = vector.broadcast %150 : vector<8x1xf32> to vector<8x384xf32>
    %154 = vector.broadcast %0 : vector<1x384xf32> to vector<8x384xf32>
    %155 = arith.mulf %153, %154 : vector<8x384xf32>
    %156 = vector.broadcast %152 : vector<8x1xf32> to vector<8x384xf32>
    %157 = vector.broadcast %0 : vector<1x384xf32> to vector<8x384xf32>
    %158 = arith.mulf %156, %157 : vector<8x384xf32>
    %159 = arith.mulf %128, %155 : vector<8x384xf32>
    %160 = arith.addf %159, %158 : vector<8x384xf32>
    %cst_49 = arith.constant 0.000000e+00 : f32
    %161 = vector.broadcast %cst_49 : f32 to vector<8x384xf32>
    %162 = arith.cmpf ogt, %160, %161 : vector<8x384xf32>
    %163 = vector.broadcast %133 : vector<8x1xf32> to vector<8x384xf32>
    %164 = arith.mulf %163, %160 : vector<8x384xf32>
    %165 = arith.select %162, %160, %164 : vector<8x384xi1>, vector<8x384xf32>
    %c0_50 = arith.constant 0 : index
    %c0_51 = arith.constant 0 : index
    %c0_52 = arith.constant 0 : index
    %166 = vector.load %arg6[%c0_50, %c0_51, %c0_52] : memref<1x8x384xf32, #tpu.memory_space<vmem>>, vector<1x8x384xf32>
    %167 = vector.shape_cast %166 : vector<1x8x384xf32> to vector<8x384xf32>
    %168 = vector.shape_cast %165 : vector<8x384xf32> to vector<1x8x384xf32>
    tpu.vector_store %arg6[%c0_50, %c0_51, %c0_52], %168 {strides = array<i32>} : memref<1x8x384xf32, #tpu.memory_space<vmem>>, vector<1x8x384xf32>,
    return
  }
  func.func @transform_0(%arg0: i32) -> (i32, i32, i32) {
    %c0_i32 = arith.constant 0 : i32
    %c0_i32_0 = arith.constant 0 : i32
    %c0_i32_1 = arith.constant 0 : i32
    return %arg0, %c0_i32, %c0_i32_0 : i32, i32, i32
  }
  func.func @transform_1(%arg0: i32) -> (i32, i32) {
    %c0_i32 = arith.constant 0 : i32
    %c0_i32_0 = arith.constant 0 : i32
    %c0_i32_1 = arith.constant 0 : i32
    return %c0_i32, %c0_i32_0 : i32, i32
  }
  func.func @transform_2(%arg0: i32) -> (i32, i32, i32) {
    %c0_i32 = arith.constant 0 : i32
    %c0_i32_0 = arith.constant 0 : i32
    %c0_i32_1 = arith.constant 0 : i32
    %c0_i32_2 = arith.constant 0 : i32
    return %c0_i32, %c0_i32_0, %c0_i32_1 : i32, i32, i32
  }
  func.func @transform_3(%arg0: i32) -> (i32, i32, i32) {
    %c0_i32 = arith.constant 0 : i32
    %c0_i32_0 = arith.constant 0 : i32
    %c0_i32_1 = arith.constant 0 : i32
    %c0_i32_2 = arith.constant 0 : i32
    return %c0_i32, %c0_i32_0, %c0_i32_1 : i32, i32, i32
  }
  func.func @transform_4(%arg0: i32) -> (i32, i32, i32) {
    %c0_i32 = arith.constant 0 : i32
    %c0_i32_0 = arith.constant 0 : i32
    %c0_i32_1 = arith.constant 0 : i32
    %c0_i32_2 = arith.constant 0 : i32
    return %c0_i32, %c0_i32_0, %c0_i32_1 : i32, i32, i32
  }
  func.func @transform_5(%arg0: i32) -> (i32, i32, i32) {
    %c0_i32 = arith.constant 0 : i32
    %c0_i32_0 = arith.constant 0 : i32
    %c0_i32_1 = arith.constant 0 : i32
    return %arg0, %c0_i32, %c0_i32_0 : i32, i32, i32
  }
}

</mosaic_0001>

<bundles_post_ra>
// kernel: tpu_custom_call.1
= control target key start
LH: loop header
LB: loop body
LE: loop exit
PB: predicated region body
PF: predicated region fallthrough
CT: control target
= control target key end

     0   :  { %10 = vsyncpa [#allocation3], 0  ;;  %s4188_s0 = inlined_call_operand.vmem [shape: f32[2,8,384], index: 0, kind: input, shape index: {}]   ;;  %s4189_s1 = inlined_call_operand.vmem [shape: f32[1,384], index: 1, kind: input, shape index: {}]   ;;  %s4190_s2 = inlined_call_operand.vmem [shape: f32[9,8,8], index: 2, kind: input, shape index: {}]   ;;  %s4191_s3 = inlined_call_operand.vmem [shape: f32[9,8,8], index: 3, kind: input, shape index: {}]   ;;  %s4192_s4 = inlined_call_operand.vmem [shape: f32[2,8,4], index: 4, kind: input, shape index: {}]   ;;  %s4193_s5 = inlined_call_operand.hbm [shape: f32[2,8,384], index: 5, kind: output, shape index: {}]  }
   0x1   :  { %12 = vsyncpa [#allocation3 + $0x1], 0  ;;  %s3663_s18 = smov 0   ;;  %s3665_s19 = smov 0  }
   0x2   :  { %s3667_s20 = smov 0   ;;  %s3669_s21 = smov 0  }
   0x3 LB: > { %s3684_s22 = sadd.s32 4294967295, %s3617_s21   ;;  %s3256_s23 = sadd.s32 4294967294, %s3617_s21   ;;  %s3617_s21 = sphi %s3669_s21, %s4199_s21   ;;  %s3613_s20 = sphi %s3667_s20, %s4198_s20   ;;  %s3609_s19 = sphi %s3665_s19, %s4197_s19   ;;  %s3605_s18 = sphi %s3663_s18, %s4196_s18  }
   0x4   : > { %s3688_s24 = sadd.s32 1, %s3617_s21   ;;  %s135_s25 = sadd.s32 1, %s3613_s20 }
   0x5   : > { %s132_s26 = ssub.s32 %s3617_s21, %s3688_s24  ;;  %p145_p0 = scmp.ne.s32.totalorder %s3613_s20, %s3609_s19 }
   0x6   : > { %p133_p1 = scmp.eq.s32.totalorder %s132_s26, 0  ;;  %p146_p2 = scmp.eq.s32.totalorder %s3684_s22, 1 }
   0x7   : > { %p151_p3 = scmp.ne.s32.totalorder %s3609_s19, %s3605_s18  ;;  %p152_p4 = scmp.eq.s32.totalorder %s3256_s23, 1 }
   0x8   : > { %s3699_s27 = scalar_select %p133_p1, %s3613_s20, %s135_s25  }
   0x9   : > { %p3701_p5 = por %p146_p2, %p145_p0  ;;  %p3705_p6 = por %p152_p4, %p151_p3 }
   0xa   : > { %p3259_p7 = scmp.ge.s32.totalorder %s3617_s21, 1  ;;  %p190_p8 = scmp.lt.s32.totalorder %s3617_s21, 3 }
   0xc   : > { %p191_p9 = pnand %p3259_p7, %p190_p8 }
   0xd   : > { %p218_p10 = scmp.lt.s32.totalorder (!%p191_p9), %s3684_s22, 1  ;;  %v3619_v0 = vmov (!%p191_p9), 0.0   ;;  %vm3620_vm0 = vmmov (!%p191_p9), 0   ;;  %s3621_s10 = smov (!%p191_p9), 18   ;;  %v244_v4 = vlaneseq (!%p191_p9)  ;;  %v230_v10 = vld [vmem:[%s4190_s2 + $0x8] sm:$0xff] (!%p191_p9)  ;;  %vm260_vm2 = vcmask (!%p191_p9), 64512  }
   0xe   : > { %194 = sbr.rel (%p191_p9) target bundleno = 1685 (0x695), region = 40  ;;  %3336 = vmatprep.subr.mxu1 (!%p191_p9), %v3619_v0  ;;  %3338 = vmatprep.mubr.msk.f32.mxu1 (!%p191_p9), %vm3620_vm0, %v3619_v0  ;;  %s3622_s11 = smov (!%p191_p9), 19   ;;  %v229_v21 = vld [vmem:[%s4190_s2] sm:$0xff] (!%p191_p9)  ;;  %v231_v29 = vld [vmem:[%s4190_s2 + $0x10] sm:$0xff] (!%p191_p9)  ;;  %v232_v34 = vld [vmem:[%s4190_s2 + $0x18] sm:$0xff] (!%p191_p9) }
   0xf   : > { %328 = vmatprep.mubr.f32.mxu0 (!%p191_p9), %v3619_v0  ;;  %s3623_s12 = smov (!%p191_p9), 17   ;;  %s3624_s13 = smov (!%p191_p9), 1   ;;  %v3775_v5 = vand.u32 (!%p191_p9), 127, %v244_v4  ;;  %v233_v39 = vld [vmem:[%s4190_s2 + $0x20] sm:$0xff] (!%p191_p9)  ;;  %v234_v46 = vld [vmem:[%s4190_s2 + $0x28] sm:$0xff] (!%p191_p9)  ;;  %v235_v52 = vld [vmem:[%s4190_s2 + $0x30] sm:$0xff] (!%p191_p9) }
  0x10   : > { %s3625_s14 = smov (!%p191_p9), 127   ;;  %s3626_s15 = smov (!%p191_p9), 111   ;;  %v236_v59 = vld [vmem:[%s4190_s2 + $0x38] sm:$0xff] (!%p191_p9)  ;;  %v237_v62 = vld [vmem:[%s4190_s2 + $0x40] sm:$0xff] (!%p191_p9)  ;;  %v1640_v63 = vshrl.u32 (!%p191_p9), %v244_v4, 7 }
  0x11   : > { %s3627_s16 = smov (!%p191_p9), 110   ;;  %s3628_s17 = smov (!%p191_p9), 109   ;;  %vm256_vm1 = vcmp.lt.s32.totalorder (!%p191_p9), %v3775_v5, 18  ;;  %vm246_vm3 = vcmp.lt.s32.totalorder (!%p191_p9), %v3775_v5, 19  ;;  %vm555_vm4 = vcmp.lt.s32.totalorder (!%p191_p9), %v3775_v5, 17  ;;  %vm712_vm5 = vcmp.lt.s32.totalorder (!%p191_p9), %v3775_v5, 1 }
  0x12   : > { %vm1016_vm6 = vcmp.lt.s32.totalorder (!%p191_p9), %v3775_v5, 127  ;;  %vm1173_vm7 = vcmp.lt.s32.totalorder (!%p191_p9), %v3775_v5, 111  ;;  %vm1330_vm8 = vcmp.lt.s32.totalorder (!%p191_p9), %v3775_v5, 110  ;;  %vm1487_vm9 = vcmp.lt.s32.totalorder (!%p191_p9), %v3775_v5, 109 }
  0x15   : > { %s219_s30 = scalar_select %p218_p10, %s3684_s22, 1 }
  0x17   : > { %s3491_s6 = smul.u32 24, %s219_s30 }
  0x19   : > { %s222_s9 = scalar_lea.vmem %s4188_s0, %s3491_s6  ;;  %s3632_s6 = smov [#allocation2]  }
  0x1a   : > { %v3720_v1 = vld [vmem:[%s222_s9 + $0x10] sm:$0xff]  ;;  %v3722_v2 = vld [vmem:[%s222_s9] sm:$0xff]  ;;  %v3728_v3 = vld [vmem:[%s222_s9 + $0x8] sm:$0xff]  ;;  %s3559_s7 = sshll.u32 %s3632_s6, 4  ;;  %s3560_s7 = int_to_ptr.vmem [resolvable:$false] %s3559_s7 }
  0x1b   : > { %254 = vrot.lane.b32.xlu1 %v3720_v1, %s3621_s10  ;;  %250 = vrot.lane.b32.xlu0 %v3722_v2, %s3621_s10 }
  0x1f   : > { %238 = vrot.lane.b32.xlu1 %v3722_v2, %s3622_s11  ;;  %252 = vrot.lane.b32.xlu0 %v3728_v3, %s3621_s10 }
  0x23   : > { %242 = vrot.lane.b32.xlu1 %v3720_v1, %s3622_s11  ;;  %240 = vrot.lane.b32.xlu0 %v3728_v3, %s3622_s11 }
  0x27   : > { %549 = vrot.lane.b32.xlu0 %v3722_v2, %s3623_s12  ;;  %551 = vrot.lane.b32.xlu1 %v3728_v3, %s3623_s12 }
  0x2b   : > { %553 = vrot.lane.b32.xlu0 %v3720_v1, %s3623_s12  ;;  %706 = vrot.lane.b32.xlu1 %v3722_v2, %s3624_s13 }
  0x2f   : > { %708 = vrot.lane.b32.xlu0 %v3728_v3, %s3624_s13  ;;  %710 = vrot.lane.b32.xlu1 %v3720_v1, %s3624_s13 }
  0x33   : > { %1012 = vrot.lane.b32.xlu0 %v3728_v3, %s3625_s14  ;;  %1014 = vrot.lane.b32.xlu1 %v3720_v1, %s3625_s14 }
  0x37   : > { %1010 = vrot.lane.b32.xlu0 %v3722_v2, %s3625_s14  ;;  %1169 = vrot.lane.b32.xlu1 %v3728_v3, %s3626_s15 }
  0x3b   : > { %1171 = vrot.lane.b32.xlu0 %v3720_v1, %s3626_s15  ;;  %1167 = vrot.lane.b32.xlu1 %v3722_v2, %s3626_s15 }
  0x3f   : > { %1326 = vrot.lane.b32.xlu0 %v3728_v3, %s3627_s16  ;;  %1328 = vrot.lane.b32.xlu1 %v3720_v1, %s3627_s16 }
  0x43   : > { %1324 = vrot.lane.b32.xlu0 %v3722_v2, %s3627_s16  ;;  %1483 = vrot.lane.b32.xlu1 %v3728_v3, %s3628_s17 }
  0x47   : > { %1485 = vrot.lane.b32.xlu0 %v3720_v1, %s3628_s17  ;;  %1481 = vrot.lane.b32.xlu1 %v3722_v2, %s3628_s17 }
  0x8d   : > { %v255_v6 = vpop.permute.xlu1 %254  ;;  %v251_v7 = vpop.permute.xlu0 %250 }
  0x8e   : > { %v259_v13 = vsel %vm256_vm1, %v255_v6, %v251_v7 }
  0x91   : > { %v239_v8 = vpop.permute.xlu1 %238  ;;  %v253_v9 = vpop.permute.xlu0 %252 }
  0x92   : > { %v258_v11 = vsel %vm256_vm1, %v251_v7, %v253_v9  ;;  %v257_v12 = vsel %vm256_vm1, %v253_v9, %v255_v6  ;;  %v1649_v6 = vsub.s32 2, %v1640_v63 }
  0x93   : > { %264 = vmatprep.subr.mxu0 %v258_v11  ;;  %3337 = vmatpush3.msra.mxu1 %v257_v12 }
  0x94   : > { %265 = vmatpush1.msra.mxu0 %v259_v13  ;;  %3339 = vmatmul.mubr.msk.f32.vlgmr.msra.gmra.mrb[0].mxu1 %vm260_vm2, %v230_v10 }
  0x95   : > { %v243_v14 = vpop.permute.xlu1 %242  ;;  %3261 = vmatmul.mubr.msk.f32.vlgmr.msra.gmra.mrb[0].mxu0 %vm260_vm2, %v230_v10  ;;  %v241_v15 = vpop.permute.xlu0 %240  ;;  %3341 = vmatprep.subr.mxu1 %v3619_v0 }
  0x96   : > { %v249_v16 = vsel %vm246_vm3, %v243_v14, %v239_v8  ;;  %v247_v17 = vsel %vm246_vm3, %v241_v15, %v243_v14  ;;  %v248_v18 = vsel %vm246_vm3, %v239_v8, %v241_v15  ;;  %3343 = vmatprep.mubr.msk.f32.mxu1 %vm3620_vm0, %v3619_v0  ;;  %472 = vmatprep.mubr.f32.mxu0 %v3619_v0 }
  0x97   : > { %408 = vmatprep.subr.mxu0 %v248_v18  ;;  %3342 = vmatpush3.msra.mxu1 %v247_v17 }
  0x98   : > { %409 = vmatpush1.msra.mxu0 %v249_v16  ;;  %3346 = vmatprep.subr.mxu1 %v3619_v0 }
  0x99   : > { %v550_v19 = vpop.permute.xlu0 %549  ;;  %v552_v20 = vpop.permute.xlu1 %551 }
  0x9a   : > { %v557_v22 = vsel %vm555_vm4, %v550_v19, %v552_v20 }
  0x9b   : > { %562 = vmatprep.subr.mxu0 %v557_v22 }
  0x9c   : > { %3344 = vmatmul.mubr.msk.f32.vlgmr.msra.gmra.mrb[0].mxu1 %vm260_vm2, %v229_v21 }
  0x9d   : > { %3263 = vmatmul.mubr.msk.f32.vlgmr.msra.gmra.mrb[0].mxu0 %vm260_vm2, %v229_v21  ;;  %v554_v23 = vpop.permute.xlu0 %553  ;;  %v707_v24 = vpop.permute.xlu1 %706  ;;  %3348 = vmatprep.mubr.msk.f32.mxu1 %vm3620_vm0, %v3619_v0 }
  0x9e   : > { %v556_v25 = vsel %vm555_vm4, %v552_v20, %v554_v23  ;;  %v558_v26 = vsel %vm555_vm4, %v554_v23, %v550_v19  ;;  %626 = vmatprep.mubr.f32.mxu0 %v3619_v0  ;;  %v3629_v23 = vmov 0  }
  0x9f   : > { %563 = vmatpush1.msra.mxu0 %v558_v26  ;;  %3347 = vmatpush3.msra.mxu1 %v556_v25 }
  0xa0   : > { %3351 = vmatprep.subr.mxu1 %v3619_v0  ;;  %3545 = vset.pattern.permute.xlu1 %v3629_v23 }
  0xa1   : > { %v709_v27 = vpop.permute.xlu0 %708  ;;  %v711_v28 = vpop.permute.xlu1 %710 }
  0xa2   : > { %v713_v30 = vsel %vm712_vm5, %v709_v27, %v711_v28  ;;  %v714_v31 = vsel %vm712_vm5, %v707_v24, %v709_v27  ;;  %v715_v32 = vsel %vm712_vm5, %v711_v28, %v707_v24 }
  0xa3   : > { %719 = vmatprep.subr.mxu0 %v714_v31  ;;  %v3630_v31 = vmov 1  }
  0xa4   : > { %3349 = vmatmul.mubr.msk.f32.vlgmr.msra.gmra.mrb[0].mxu1 %vm260_vm2, %v231_v29  ;;  %3546 = vset.pattern.permute.xlu0 %v3630_v31 }
  0xa5   : > { %3265 = vmatmul.mubr.msk.f32.vlgmr.msra.gmra.mrb[0].mxu0 %vm260_vm2, %v231_v29  ;;  %3352 = vmatpush3.msra.mxu1 %v713_v30  ;;  %v1013_v33 = vpop.permute.xlu0 %1012  ;;  %v1015_v35 = vpop.permute.xlu1 %1014 }
  0xa6   : > { %720 = vmatpush1.msra.mxu0 %v715_v32  ;;  %3353 = vmatprep.mubr.msk.f32.mxu1 %vm3620_vm0, %v3619_v0  ;;  %v1017_v36 = vsel %vm1016_vm6, %v1013_v33, %v1015_v35  ;;  %v224_v32 = vld [vmem:[%s4192_s4] sm:$0xff] }
  0xa7   : > { %783 = vmatprep.mubr.f32.mxu0 %v3619_v0  ;;  %866 = vmatprep.subr.mxu0 %v3728_v3  ;;  %v1645_v3 = vsub.s32 1, %v1640_v63 }
  0xa8   : > { %3356 = vmatprep.subr.mxu1 %v3619_v0 }
  0xa9   : > { %v1011_v37 = vpop.permute.xlu0 %1010  ;;  %v1170_v38 = vpop.permute.xlu1 %1169 }
  0xaa   : > { %v1019_v41 = vsel %vm1016_vm6, %v1015_v35, %v1011_v37  ;;  %v1018_v42 = vsel %vm1016_vm6, %v1011_v37, %v1013_v33 }
  0xac   : > { %3354 = vmatmul.mubr.msk.f32.vlgmr.msra.gmra.mrb[0].mxu1 %vm260_vm2, %v232_v34 }
  0xad   : > { %3267 = vmatmul.mubr.msk.f32.vlgmr.msra.gmra.mrb[0].mxu0 %vm260_vm2, %v232_v34  ;;  %3357 = vmatpush3.msra.mxu1 %v3720_v1  ;;  %v1172_v40 = vpop.permute.xlu0 %1171  ;;  %v1168_v44 = vpop.permute.xlu1 %1167  ;;  %v1641_v1 = vsub.s32 0, %v1640_v63 }
  0xae   : > { %867 = vmatpush1.msra.mxu0 %v3722_v2  ;;  %3358 = vmatprep.mubr.msk.f32.mxu1 %vm3620_vm0, %v3619_v0  ;;  %v1174_v43 = vsel %vm1173_vm7, %v1170_v38, %v1172_v40  ;;  %v1176_v48 = vsel %vm1173_vm7, %v1172_v40, %v1168_v44  ;;  %v1175_v49 = vsel %vm1173_vm7, %v1168_v44, %v1170_v38  ;;  %v223_v2 = vld [vmem:[%s4189_s1] sm:$0x7] }
  0xaf   : > { %930 = vmatprep.mubr.f32.mxu0 %v3619_v0  ;;  %1023 = vmatprep.subr.mxu0 %v1017_v36  ;;  %v3921_v7 = vrot.slane %v223_v2, %v1641_v1  ;;  %v3923_v8 = vrot.slane %v223_v2, %v1645_v3  ;;  %v3925_v9 = vrot.slane %v223_v2, %v1649_v6  ;;  %v3631_v36 = vmov 2   ;;  %v1719_v1 = vld [vmem:[%s4191_s3 + $0x8] sm:$0xff] }
  0xb0   : > { %3361 = vmatprep.subr.mxu1 %v3619_v0 }
  0xb1   : > { %v1327_v45 = vpop.permute.xlu0 %1326  ;;  %v1329_v47 = vpop.permute.xlu1 %1328 }
  0xb2   : > { %v1331_v50 = vsel %vm1330_vm8, %v1327_v45, %v1329_v47 }
  0xb4   : > { %3359 = vmatmul.mubr.msk.f32.vlgmr.msra.gmra.mrb[0].mxu1 %vm260_vm2, %v233_v39 }
  0xb5   : > { %3269 = vmatmul.mubr.msk.f32.vlgmr.msra.gmra.mrb[0].mxu0 %vm260_vm2, %v233_v39  ;;  %3362 = vmatpush3.msra.mxu1 %v1019_v41  ;;  %v1325_v51 = vpop.permute.xlu0 %1324  ;;  %v1484_v55 = vpop.permute.xlu1 %1483 }
  0xb6   : > { %1024 = vmatpush1.msra.mxu0 %v1018_v42  ;;  %3363 = vmatprep.mubr.msk.f32.mxu1 %vm3620_vm0, %v3619_v0  ;;  %v1333_v54 = vsel %vm1330_vm8, %v1329_v47, %v1325_v51  ;;  %v1332_v56 = vsel %vm1330_vm8, %v1325_v51, %v1327_v45 }
  0xb7   : > { %1087 = vmatprep.mubr.f32.mxu0 %v3619_v0  ;;  %1180 = vmatprep.subr.mxu0 %v1174_v43 }
  0xb8   : > { %3366 = vmatprep.subr.mxu1 %v3619_v0 }
  0xb9   : > { %v1486_v53 = vpop.permute.xlu0 %1485  ;;  %v1482_v58 = vpop.permute.xlu1 %1481 }
  0xba   : > { %v1488_v57 = vsel %vm1487_vm9, %v1484_v55, %v1486_v53  ;;  %v1490_v60 = vsel %vm1487_vm9, %v1486_v53, %v1482_v58  ;;  %v1489_v61 = vsel %vm1487_vm9, %v1482_v58, %v1484_v55 }
  0xbc   : > { %3364 = vmatmul.mubr.msk.f32.vlgmr.msra.gmra.mrb[0].mxu1 %vm260_vm2, %v234_v46 }
  0xbd   : > { %3271 = vmatmul.mubr.msk.f32.vlgmr.msra.gmra.mrb[0].mxu0 %vm260_vm2, %v234_v46  ;;  %3367 = vmatpush3.msra.mxu1 %v1176_v48 }
  0xbe   : > { %1181 = vmatpush1.msra.mxu0 %v1175_v49  ;;  %3368 = vmatprep.mubr.msk.f32.mxu1 %vm3620_vm0, %v3619_v0 }
  0xbf   : > { %1244 = vmatprep.mubr.f32.mxu0 %v3619_v0  ;;  %1337 = vmatprep.subr.mxu0 %v1331_v50 }
  0xc0   : > { %3371 = vmatprep.subr.mxu1 %v3619_v0 }
  0xc4   : > { %3369 = vmatmul.mubr.msk.f32.vlgmr.msra.gmra.mrb[0].mxu1 %vm260_vm2, %v235_v52 }
  0xc5   : > { %3273 = vmatmul.mubr.msk.f32.vlgmr.msra.gmra.mrb[0].mxu0 %vm260_vm2, %v235_v52  ;;  %3372 = vmatpush3.msra.mxu1 %v1333_v54 }
  0xc6   : > { %1338 = vmatpush1.msra.mxu0 %v1332_v56  ;;  %3373 = vmatprep.mubr.msk.f32.mxu1 %vm3620_vm0, %v3619_v0 }
  0xc7   : > { %1401 = vmatprep.mubr.f32.mxu0 %v3619_v0  ;;  %1494 = vmatprep.subr.mxu0 %v1488_v57 }
  0xc8   : > { %3376 = vmatprep.subr.mxu1 %v3619_v0 }
  0xcc   : > { %3374 = vmatmul.mubr.msk.f32.vlgmr.msra.gmra.mrb[0].mxu1 %vm260_vm2, %v236_v59 }
  0xcd   : > { %3275 = vmatmul.mubr.msk.f32.vlgmr.msra.gmra.mrb[0].mxu0 %vm260_vm2, %v236_v59  ;;  %3377 = vmatpush3.msra.mxu1 %v1490_v60 }
  0xce   : > { %1495 = vmatpush1.msra.mxu0 %v1489_v61  ;;  %3378 = vmatprep.mubr.msk.f32.mxu1 %vm3620_vm0, %v3619_v0 }
  0xcf   : > { %1558 = vmatprep.mubr.f32.mxu0 %v3619_v0  ;;  %3381 = vmatprep.subr.mxu1 %v3619_v0 }
  0xd4   : > { %3379 = vmatmul.mubr.msk.f32.vlgmr.msra.gmra.mrb[0].mxu1 %vm260_vm2, %v237_v62 }
  0xd5   : > { %3277 = vmatmul.mubr.msk.f32.vlgmr.msra.gmra.mrb[0].mxu0 %vm260_vm2, %v237_v62  ;;  %3383 = vmatprep.mubr.msk.f32.mxu1 %vm3620_vm0, %v3619_v0 }
  0xd6   : > { %1812 = vmatprep.mubr.f32.mxu0 %v3619_v0 }
 0x1a7   : > { %v1631_v10 = vpop.f32.mrb[0].mxu1 }
 0x1a8   : > { %v1560_v11 = vpop.f32.mrb[0].mxu0  ;;  %v3380_v12 = vpop.f32.mrb[1].mxu1  ;;  %v1656_v15 = vmul.f32 %v3925_v9, %v1631_v10 }
 0x1a9   : > { %v1654_v13 = vmul.f32 %v3921_v7, %v1560_v11  ;;  %v1562_v14 = vpop.f32.mrb[1].mxu0 }
 0x1aa   : > { %v1655_v4 = vmul.f32 %v3923_v8, %v1562_v14  ;;  %v1663_v20 = vmul.f32 %v1656_v15, %v1631_v10 }
 0x1ab   : > { %v1661_v16 = vmul.f32 %v1654_v13, %v1560_v11 }
 0x1ac   : > { %v1662_v17 = vmul.f32 %v1655_v4, %v1562_v14  ;;  %v1657_v18 = vadd.f32 %v1655_v4, %v1654_v13 }
 0x1ae   : > { %v1658_v19 = vadd.f32 %v1657_v18, %v1656_v15  ;;  %v1664_v21 = vadd.f32 %v1662_v17, %v1661_v16  ;;  %v1718_v15 = vld [vmem:[%s4191_s3] sm:$0xff] }
 0x1b0   : > { %1659 = vadd.xlane.f32.xlu0 %v1658_v19  ;;  %v1665_v22 = vadd.f32 %v1664_v21, %v1663_v20 }
 0x1b2   : > { %1666 = vadd.xlane.f32.xlu1 %v1665_v22 }
 0x23d   : > { %v1660_v24 = vpop.xlane.xlu0 %1659 }
 0x23e   : > { %v1669_v25 = vmul.f32 0.00390625, %v1660_v24 }
 0x23f   : > { %v1667_v26 = vpop.xlane.xlu1 %1666 }
 0x240   : > { %v1671_v27 = vmul.f32 %v1669_v25, %v1669_v25  ;;  %v1670_v28 = vmul.f32 0.00390625, %v1667_v26 }
 0x242   : > { %v1672_v29 = vsub.f32 %v1670_v28, %v1671_v27 }
 0x244   : > { %v1673_v30 = vadd.f32 1e-05, %v1672_v29 }
 0x246   : > { %3551 = vrsqrt.f32 %v1673_v30  ;;  %v1721_v30 = vld [vmem:[%s4191_s3 + $0x18] sm:$0xff] }
 0x250   : > { %v3552_v33 = vpop.eup %3551 }
 0x251   : > { %v1675_v34 = vmul.f32 %v3552_v33, %v224_v32 }
 0x253   : > { %1684 = vperm.xlu1 %3545, %v1675_v34   ;;  %v1676_v35 = vmul.f32 %v1675_v34, %v1669_v25 }
 0x255   : > { %1678 = vrot.lane.b32.xlu0 %v1676_v35, %s3624_s13 }
 0x257   : > { %3547 = vset.pattern.permute.xlu1 %v3631_v36 }
 0x258   : > { %1709 = vperm.xlu1 %3547, %v224_v32  }
 0x25c   : > { %3548 = vset.pattern.permute.xlu1 %v3629_v23  ;;  %v1720_v23 = vld [vmem:[%s4191_s3 + $0x10] sm:$0xff] }
 0x2c7   : > { %v1679_v37 = vpop.permute.xlu0 %1678 }
 0x2c8   : > { %v1681_v38 = vsub.f32 %v224_v32, %v1679_v37 }
 0x2ca   : > { %1692 = vperm.xlu0 %3546, %v1681_v38  }
 0x2ce   : > { %3550 = vset.pattern.permute.xlu0 %v3631_v36  ;;  %v1722_v36 = vld [vmem:[%s4191_s3 + $0x20] sm:$0xff] }
 0x2d2   : > { %v1685_v39 = vpop.permute.xlu1 %1684 }
 0x2d3   : > { %v1687_v40 = vmul.f32 %v1685_v39, %v3921_v7  ;;  %v1688_v41 = vmul.f32 %v1685_v39, %v3923_v8  ;;  %v1689_v42 = vmul.f32 %v1685_v39, %v3925_v9 }
 0x2d5   : > { %v1698_v43 = vmul.f32 %v1687_v40, %v1560_v11  ;;  %v1699_v44 = vmul.f32 %v1688_v41, %v1562_v14  ;;  %v1700_v46 = vmul.f32 %v1689_v42, %v1631_v10  ;;  %v1723_v42 = vld [vmem:[%s4191_s3 + $0x28] sm:$0xff] }
 0x2d7   : > { %v1710_v50 = vpop.permute.xlu1 %1709 }
 0x349   : > { %v1693_v45 = vpop.permute.xlu0 %1692 }
 0x34a   : > { %v1695_v47 = vmul.f32 %v1693_v45, %v3921_v7  ;;  %v1696_v48 = vmul.f32 %v1693_v45, %v3923_v8  ;;  %v1697_v49 = vmul.f32 %v1693_v45, %v3925_v9 }
 0x34c   : > { %v1701_v51 = vadd.f32 %v1698_v43, %v1695_v47  ;;  %v1702_v52 = vadd.f32 %v1699_v44, %v1696_v48  ;;  %v1703_v53 = vadd.f32 %v1700_v46, %v1697_v49  ;;  %v1724_v48 = vld [vmem:[%s4191_s3 + $0x30] sm:$0xff] }
 0x34e   : > { %vm1704_vm10 = vcmp.gt.f32.partialorder %v1701_v51, 0.0  ;;  %vm1705_vm11 = vcmp.gt.f32.partialorder %v1702_v52, 0.0  ;;  %v1712_v54 = vmul.f32 %v1710_v50, %v1701_v51  ;;  %v1713_v55 = vmul.f32 %v1710_v50, %v1702_v52 }
 0x34f   : > { %v1714_v56 = vmul.f32 %v1710_v50, %v1703_v53  ;;  %vm1706_vm12 = vcmp.gt.f32.partialorder %v1703_v53, 0.0 }
 0x350   : > { %v3941_v57 = vsel %vm1704_vm10, %v1701_v51, %v1712_v54  ;;  %v3943_v58 = vsel %vm1705_vm11, %v1702_v52, %v1713_v55  ;;  %v1725_v55 = vld [vmem:[%s4191_s3 + $0x38] sm:$0xff] }
 0x351   : > { %1736 = vrot.lane.b32.xlu1 %v3941_v57, %s3621_s10  ;;  %1738 = vrot.lane.b32.xlu0 %v3943_v58, %s3621_s10  ;;  %v3949_v59 = vsel %vm1706_vm12, %v1703_v53, %v1714_v56 }
 0x355   : > { %1740 = vrot.lane.b32.xlu1 %v3949_v59, %s3621_s10  ;;  %1727 = vrot.lane.b32.xlu0 %v3941_v57, %s3622_s11  ;;  %s3561_s10 = scalar_lea.vmem %s3560_s7, 768 }
 0x359   : > { %1729 = vrot.lane.b32.xlu1 %v3943_v58, %s3622_s11  ;;  %1731 = vrot.lane.b32.xlu0 %v3949_v59, %s3622_s11 }
 0x35d   : > { %2033 = vrot.lane.b32.xlu1 %v3941_v57, %s3623_s12  ;;  %2035 = vrot.lane.b32.xlu0 %v3943_v58, %s3623_s12 }
 0x361   : > { %2037 = vrot.lane.b32.xlu1 %v3949_v59, %s3623_s12  ;;  %2189 = vrot.lane.b32.xlu0 %v3941_v57, %s3624_s13 }
 0x365   : > { %2191 = vrot.lane.b32.xlu1 %v3943_v58, %s3624_s13  ;;  %2193 = vrot.lane.b32.xlu0 %v3949_v59, %s3624_s13 }
 0x369   : > { %2494 = vrot.lane.b32.xlu1 %v3943_v58, %s3625_s14  ;;  %2496 = vrot.lane.b32.xlu0 %v3949_v59, %s3625_s14 }
 0x36d   : > { %2492 = vrot.lane.b32.xlu1 %v3941_v57, %s3625_s14  ;;  %2650 = vrot.lane.b32.xlu0 %v3943_v58, %s3626_s15 }
 0x371   : > { %2652 = vrot.lane.b32.xlu1 %v3949_v59, %s3626_s15  ;;  %2648 = vrot.lane.b32.xlu0 %v3941_v57, %s3626_s15 }
 0x375   : > { %2806 = vrot.lane.b32.xlu1 %v3943_v58, %s3627_s16  ;;  %2808 = vrot.lane.b32.xlu0 %v3949_v59, %s3627_s16 }
 0x379   : > { %2804 = vrot.lane.b32.xlu1 %v3941_v57, %s3627_s16  ;;  %2962 = vrot.lane.b32.xlu0 %v3943_v58, %s3628_s17  ;;  %s215_s16 = sand.u32 1, %s3609_s19  }
 0x37d   : > { %2964 = vrot.lane.b32.xlu1 %v3949_v59, %s3628_s17  ;;  %2960 = vrot.lane.b32.xlu0 %v3941_v57, %s3628_s17  ;;  %s3490_s17 = smul.u32 24, %s215_s16 }
 0x37f   : > { %s217_s8 = scalar_lea.vmem [#allocation2], %s3490_s17 }
 0x380   : > { %s3197_s9 = sshll.u32 %s217_s8, 4  ;;  %s4146_s9 = int_to_ptr.vmem [resolvable:$true] %s3197_s9 }
 0x381   : > { %s3555_s30 = scalar_lea.vmem %s4146_s9, 384  ;;  %p3562_p0 = scmp.lt.s32.totalorder %s4146_s9, %s3560_s7 }
 0x382   : > { %p3556_p11 = scmp.ne.s32.totalorder %s4146_s9, %s3555_s30  ;;  %p3563_p1 = scmp.lt.s32.totalorder %s3561_s10, %s3555_s30 }
 0x384   : > { %p3557_p12 = pnand %p3556_p11, %p3701_p5  ;;  %p3564_p2 = por %p3563_p1, %p3562_p0 }
 0x386   : > { %p3558_p13 = pneg %p3557_p12 }
 0x388   : > { %p3565_p3 = pnand %p3564_p2, %p3558_p13 }
 0x3c3   : > { %v1737_v60 = vpop.permute.xlu1 %1736  ;;  %v1739_v61 = vpop.permute.xlu0 %1738 }
 0x3c4   : > { %v1743_v62 = vsel %vm256_vm1, %v1737_v60, %v1739_v61 }
 0x3c5   : > { %1748 = vmatprep.subr.mxu0 %v1743_v62 }
 0x3c7   : > { %v1741_v63 = vpop.permute.xlu1 %1740  ;;  %v1728_v2 = vpop.permute.xlu0 %1727 }
 0x3c8   : > { %v1742_v3 = vsel %vm256_vm1, %v1739_v61, %v1741_v63  ;;  %v1744_v6 = vsel %vm256_vm1, %v1741_v63, %v1737_v60 }
 0x3c9   : > { %1749 = vmatpush1.msra.mxu0 %v1744_v6  ;;  %3382 = vmatpush3.msra.mxu1 %v1742_v3 }
 0x3ca   : > { %3279 = vmatmul.mubr.msk.f32.vlgmr.msra.gmra.mrb[2].mxu0 %vm260_vm2, %v1719_v1  ;;  %3384 = vmatmul.mubr.msk.f32.vlgmr.msra.gmra.mrb[2].mxu1 %vm260_vm2, %v1719_v1 }
 0x3cb   : > { %v1730_v10 = vpop.permute.xlu1 %1729  ;;  %3386 = vmatprep.subr.mxu1 %v3619_v0  ;;  %1956 = vmatprep.mubr.f32.mxu0 %v3619_v0  ;;  %v1732_v11 = vpop.permute.xlu0 %1731 }
 0x3cc   : > { %v1734_v12 = vsel %vm246_vm3, %v1728_v2, %v1730_v10  ;;  %3388 = vmatprep.mubr.msk.f32.mxu1 %vm3620_vm0, %v3619_v0  ;;  %v1735_v13 = vsel %vm246_vm3, %v1732_v11, %v1728_v2  ;;  %v1733_v14 = vsel %vm246_vm3, %v1730_v10, %v1732_v11 }
 0x3cd   : > { %1892 = vmatprep.subr.mxu0 %v1734_v12  ;;  %3387 = vmatpush3.msra.mxu1 %v1733_v14 }
 0x3ce   : > { %1893 = vmatpush1.msra.mxu0 %v1735_v13  ;;  %3391 = vmatprep.subr.mxu1 %v3619_v0 }
 0x3cf   : > { %v2034_v4 = vpop.permute.xlu1 %2033  ;;  %v2036_v16 = vpop.permute.xlu0 %2035 }
 0x3d0   : > { %v2040_v17 = vsel %vm555_vm4, %v2034_v4, %v2036_v16 }
 0x3d1   : > { %2045 = vmatprep.subr.mxu0 %v2040_v17 }
 0x3d2   : > { %3281 = vmatmul.mubr.msk.f32.vlgmr.msra.gmra.mrb[2].mxu0 %vm260_vm2, %v1718_v15  ;;  %3389 = vmatmul.mubr.msk.f32.vlgmr.msra.gmra.mrb[2].mxu1 %vm260_vm2, %v1718_v15 }
 0x3d3   : > { %v2038_v18 = vpop.permute.xlu1 %2037  ;;  %2109 = vmatprep.mubr.f32.mxu0 %v3619_v0  ;;  %v2190_v19 = vpop.permute.xlu0 %2189  ;;  %3393 = vmatprep.mubr.msk.f32.mxu1 %vm3620_vm0, %v3619_v0 }
 0x3d4   : > { %v2039_v20 = vsel %vm555_vm4, %v2036_v16, %v2038_v18  ;;  %v2041_v21 = vsel %vm555_vm4, %v2038_v18, %v2034_v4 }
 0x3d5   : > { %2046 = vmatpush1.msra.mxu0 %v2041_v21  ;;  %3392 = vmatpush3.msra.mxu1 %v2039_v20 }
 0x3d6   : > { %3396 = vmatprep.subr.mxu1 %v3619_v0 }
 0x3d7   : > { %v2192_v22 = vpop.permute.xlu1 %2191  ;;  %v2194_v24 = vpop.permute.xlu0 %2193 }
 0x3d8   : > { %v2196_v25 = vsel %vm712_vm5, %v2190_v19, %v2192_v22  ;;  %v2197_v26 = vsel %vm712_vm5, %v2194_v24, %v2190_v19  ;;  %v2195_v27 = vsel %vm712_vm5, %v2192_v22, %v2194_v24  ;;  %v225_v19 = vld [vmem:[%s4192_s4 + $0x8] sm:$0xff] }
 0x3d9   : > { %2201 = vmatprep.subr.mxu0 %v2196_v25 }
 0x3da   : > { %3283 = vmatmul.mubr.msk.f32.vlgmr.msra.gmra.mrb[2].mxu0 %vm260_vm2, %v1720_v23  ;;  %3394 = vmatmul.mubr.msk.f32.vlgmr.msra.gmra.mrb[2].mxu1 %vm260_vm2, %v1720_v23 }
 0x3db   : > { %2202 = vmatpush1.msra.mxu0 %v2197_v26  ;;  %v2495_v28 = vpop.permute.xlu1 %2494  ;;  %3397 = vmatpush3.msra.mxu1 %v2195_v27  ;;  %v2497_v29 = vpop.permute.xlu0 %2496 }
 0x3dc   : > { %2348 = vmatprep.subr.mxu0 %v3943_v58  ;;  %2265 = vmatprep.mubr.f32.mxu0 %v3619_v0  ;;  %v2498_v33 = vsel %vm1016_vm6, %v2495_v28, %v2497_v29  ;;  %v1726_v58 = vld [vmem:[%s4191_s3 + $0x40] sm:$0xff] }
 0x3dd   : > { %3398 = vmatprep.mubr.msk.f32.mxu1 %vm3620_vm0, %v3619_v0  ;;  %3401 = vmatprep.subr.mxu1 %v3619_v0 }
 0x3df   : > { %v2493_v32 = vpop.permute.xlu1 %2492  ;;  %v2651_v34 = vpop.permute.xlu0 %2650 }
 0x3e0   : > { %v2499_v37 = vsel %vm1016_vm6, %v2493_v32, %v2495_v28  ;;  %v2500_v39 = vsel %vm1016_vm6, %v2497_v29, %v2493_v32 }
 0x3e2   : > { %3285 = vmatmul.mubr.msk.f32.vlgmr.msra.gmra.mrb[2].mxu0 %vm260_vm2, %v1721_v30  ;;  %3399 = vmatmul.mubr.msk.f32.vlgmr.msra.gmra.mrb[2].mxu1 %vm260_vm2, %v1721_v30 }
 0x3e3   : > { %2349 = vmatpush1.msra.mxu0 %v3941_v57  ;;  %3402 = vmatpush3.msra.mxu1 %v3949_v59  ;;  %v2653_v35 = vpop.permute.xlu1 %2652  ;;  %v2649_v38 = vpop.permute.xlu0 %2648 }
 0x3e4   : > { %2504 = vmatprep.subr.mxu0 %v2498_v33  ;;  %2412 = vmatprep.mubr.f32.mxu0 %v3619_v0  ;;  %v2654_v40 = vsel %vm1173_vm7, %v2651_v34, %v2653_v35  ;;  %v2655_v44 = vsel %vm1173_vm7, %v2649_v38, %v2651_v34  ;;  %v2656_v46 = vsel %vm1173_vm7, %v2653_v35, %v2649_v38 }
 0x3e5   : > { %3403 = vmatprep.mubr.msk.f32.mxu1 %vm3620_vm0, %v3619_v0  ;;  %3406 = vmatprep.subr.mxu1 %v3619_v0 }
 0x3e7   : > { %v2807_v41 = vpop.permute.xlu1 %2806  ;;  %v2809_v43 = vpop.permute.xlu0 %2808 }
 0x3e8   : > { %v2810_v47 = vsel %vm1330_vm8, %v2807_v41, %v2809_v43 }
 0x3ea   : > { %3287 = vmatmul.mubr.msk.f32.vlgmr.msra.gmra.mrb[2].mxu0 %vm260_vm2, %v1722_v36  ;;  %3404 = vmatmul.mubr.msk.f32.vlgmr.msra.gmra.mrb[2].mxu1 %vm260_vm2, %v1722_v36 }
 0x3eb   : > { %2505 = vmatpush1.msra.mxu0 %v2499_v37  ;;  %3407 = vmatpush3.msra.mxu1 %v2500_v39  ;;  %v2805_v45 = vpop.permute.xlu1 %2804  ;;  %v2963_v50 = vpop.permute.xlu0 %2962 }
 0x3ec   : > { %2660 = vmatprep.subr.mxu0 %v2654_v40  ;;  %2568 = vmatprep.mubr.f32.mxu0 %v3619_v0  ;;  %v2811_v51 = vsel %vm1330_vm8, %v2805_v45, %v2807_v41  ;;  %v2812_v52 = vsel %vm1330_vm8, %v2809_v43, %v2805_v45 }
 0x3ed   : > { %3408 = vmatprep.mubr.msk.f32.mxu1 %vm3620_vm0, %v3619_v0  ;;  %3411 = vmatprep.subr.mxu1 %v3619_v0 }
 0x3ef   : > { %v2965_v49 = vpop.permute.xlu1 %2964  ;;  %v2961_v54 = vpop.permute.xlu0 %2960 }
 0x3f0   : > { %v2966_v53 = vsel %vm1487_vm9, %v2963_v50, %v2965_v49  ;;  %v2967_v56 = vsel %vm1487_vm9, %v2961_v54, %v2963_v50  ;;  %v2968_v57 = vsel %vm1487_vm9, %v2965_v49, %v2961_v54 }
 0x3f2   : > { %3289 = vmatmul.mubr.msk.f32.vlgmr.msra.gmra.mrb[2].mxu0 %vm260_vm2, %v1723_v42  ;;  %3409 = vmatmul.mubr.msk.f32.vlgmr.msra.gmra.mrb[2].mxu1 %vm260_vm2, %v1723_v42 }
 0x3f3   : > { %2661 = vmatpush1.msra.mxu0 %v2655_v44  ;;  %3412 = vmatpush3.msra.mxu1 %v2656_v46 }
 0x3f4   : > { %2816 = vmatprep.subr.mxu0 %v2810_v47  ;;  %2724 = vmatprep.mubr.f32.mxu0 %v3619_v0 }
 0x3f5   : > { %3413 = vmatprep.mubr.msk.f32.mxu1 %vm3620_vm0, %v3619_v0  ;;  %3416 = vmatprep.subr.mxu1 %v3619_v0 }
 0x3fa   : > { %3291 = vmatmul.mubr.msk.f32.vlgmr.msra.gmra.mrb[2].mxu0 %vm260_vm2, %v1724_v48  ;;  %3414 = vmatmul.mubr.msk.f32.vlgmr.msra.gmra.mrb[2].mxu1 %vm260_vm2, %v1724_v48 }
 0x3fb   : > { %2817 = vmatpush1.msra.mxu0 %v2811_v51  ;;  %3417 = vmatpush3.msra.mxu1 %v2812_v52 }
 0x3fc   : > { %2972 = vmatprep.subr.mxu0 %v2966_v53  ;;  %2880 = vmatprep.mubr.f32.mxu0 %v3619_v0 }
 0x3fd   : > { %3418 = vmatprep.mubr.msk.f32.mxu1 %vm3620_vm0, %v3619_v0  ;;  %3421 = vmatprep.subr.mxu1 %v3619_v0 }
 0x402   : > { %3293 = vmatmul.mubr.msk.f32.vlgmr.msra.gmra.mrb[2].mxu0 %vm260_vm2, %v1725_v55  ;;  %3419 = vmatmul.mubr.msk.f32.vlgmr.msra.gmra.mrb[2].mxu1 %vm260_vm2, %v1725_v55 }
 0x403   : > { %2973 = vmatpush1.msra.mxu0 %v2967_v56  ;;  %3422 = vmatpush3.msra.mxu1 %v2968_v57 }
 0x404   : > { %3036 = vmatprep.mubr.f32.mxu0 %v3619_v0  ;;  %3423 = vmatprep.mubr.msk.f32.mxu1 %vm3620_vm0, %v3619_v0 }
 0x40a   : > { %3295 = vmatmul.mubr.msk.f32.vlgmr.msra.gmra.mrb[2].mxu0 %vm260_vm2, %v1726_v58  ;;  %3424 = vmatmul.mubr.msk.f32.vlgmr.msra.gmra.mrb[2].mxu1 %vm260_vm2, %v1726_v58 }
 0x4dd   : > { %v3038_v59 = vpop.f32.mrb[2].mxu0  ;;  %v3109_v60 = vpop.f32.mrb[2].mxu1 }
 0x4de   : > { %v3116_v5 = vmul.f32 %v3038_v59, %v3921_v7  ;;  %v3040_v61 = vpop.f32.mrb[3].mxu0  ;;  %v3425_v63 = vpop.f32.mrb[3].mxu1  ;;  %v3118_v1 = vmul.f32 %v3109_v60, %v3925_v9 }
 0x4df   : > { %v3117_v62 = vmul.f32 %v3040_v61, %v3923_v8 }
 0x4e0   : > { %v3123_v2 = vmul.f32 %v3116_v5, %v3038_v59  ;;  %v3125_v10 = vmul.f32 %v3118_v1, %v3109_v60 }
 0x4e1   : > { %v3124_v0 = vmul.f32 %v3117_v62, %v3040_v61  ;;  %v3119_v3 = vadd.f32 %v3117_v62, %v3116_v5 }
 0x4e3   : > { %v3120_v6 = vadd.f32 %v3119_v3, %v3118_v1  ;;  %v3126_v11 = vadd.f32 %v3124_v0, %v3123_v2 }
 0x4e5   : > { %3121 = vadd.xlane.f32.xlu1 %v3120_v6  ;;  %v3127_v12 = vadd.f32 %v3126_v11, %v3125_v10 }
 0x4e7   : > { %3128 = vadd.xlane.f32.xlu0 %v3127_v12 }
 0x572   : > { %v3122_v13 = vpop.xlane.xlu1 %3121 }
 0x573   : > { %v3130_v14 = vmul.f32 0.00390625, %v3122_v13 }
 0x574   : > { %v3129_v4 = vpop.xlane.xlu0 %3128 }
 0x575   : > { %v3132_v15 = vmul.f32 %v3130_v14, %v3130_v14  ;;  %v3131_v16 = vmul.f32 0.00390625, %v3129_v4 }
 0x577   : > { %v3133_v17 = vsub.f32 %v3131_v16, %v3132_v15 }
 0x579   : > { %v3134_v18 = vadd.f32 1e-05, %v3133_v17 }
 0x57b   : > { %3553 = vrsqrt.f32 %v3134_v18 }
 0x585   : > { %v3554_v20 = vpop.eup %3553 }
 0x586   : > { %v3136_v21 = vmul.f32 %v3554_v20, %v225_v19 }
 0x588   : > { %3145 = vperm.xlu1 %3548, %v3136_v21   ;;  %v3137_v22 = vmul.f32 %v3136_v21, %v3130_v14 }
 0x58a   : > { %3139 = vrot.lane.b32.xlu0 %v3137_v22, %s3624_s13  ;;  %s3492_s13 = smul.u32 384, %s3684_s22  ;;  %s3183_s22 = scalar_lea.sflag [#allocation3], %s215_s16 }
 0x58c   : > { %3549 = vset.pattern.permute.xlu1 %v3630_v31  ;;  %s4144_s26 = scalar_lea.hbm %s4193_s5, %s3492_s13 }
 0x58e   : > { %3170 = vperm.xlu0 %3550, %v225_v19  }
 0x5fc   : > { %v3140_v23 = vpop.permute.xlu0 %3139 }
 0x5fd   : > { %v3142_v24 = vsub.f32 %v225_v19, %v3140_v23 }
 0x5ff   : > { %3153 = vperm.xlu1 %3549, %v3142_v24  }
 0x607   : > { %v3146_v25 = vpop.permute.xlu1 %3145 }
 0x608   : > { %v3148_v26 = vmul.f32 %v3146_v25, %v3921_v7  ;;  %v3149_v27 = vmul.f32 %v3146_v25, %v3923_v8  ;;  %v3150_v28 = vmul.f32 %v3146_v25, %v3925_v9 }
 0x60a   : > { %v3159_v29 = vmul.f32 %v3148_v26, %v3038_v59  ;;  %v3160_v30 = vmul.f32 %v3149_v27, %v3040_v61  ;;  %v3161_v33 = vmul.f32 %v3150_v28, %v3109_v60 }
 0x60d   : > { %v3171_v36 = vpop.permute.xlu0 %3170 }
 0x67e   : > { %v3154_v32 = vpop.permute.xlu1 %3153 }
 0x67f   : > { %v3156_v31 = vmul.f32 %v3154_v32, %v3921_v7  ;;  %v3157_v34 = vmul.f32 %v3154_v32, %v3923_v8  ;;  %v3158_v35 = vmul.f32 %v3154_v32, %v3925_v9 }
 0x681   : > { %v3162_v37 = vadd.f32 %v3159_v29, %v3156_v31  ;;  %v3163_v38 = vadd.f32 %v3160_v30, %v3157_v34  ;;  %v3164_v39 = vadd.f32 %v3161_v33, %v3158_v35 }
 0x683   : > { %vm3165_vm13 = vcmp.gt.f32.partialorder %v3162_v37, 0.0  ;;  %vm3166_vm14 = vcmp.gt.f32.partialorder %v3163_v38, 0.0  ;;  %vm3167_vm15 = vcmp.gt.f32.partialorder %v3164_v39, 0.0  ;;  %v3173_v40 = vmul.f32 %v3171_v36, %v3162_v37 }
 0x684   : > { %v3174_v41 = vmul.f32 %v3171_v36, %v3163_v38  ;;  %v3175_v42 = vmul.f32 %v3171_v36, %v3164_v39 }
 0x685   : > { %v3176_v7 = vsel %vm3165_vm13, %v3162_v37, %v3173_v40 }
 0x686   : > { %v3177_v8 = vsel %vm3166_vm14, %v3163_v38, %v3174_v41  ;;  %v3178_v9 = vsel %vm3167_vm15, %v3164_v39, %v3175_v42  ;;  %3179 = vst [vmem:[%s217_s8] sm:$0xff] %v3176_v7 }
 0x687   : > { %3180 = vst [vmem:[%s217_s8 + $0x8] sm:$0xff] %v3177_v8  ;;  %3181 = vst [vmem:[%s217_s8 + $0x10] sm:$0xff] %v3178_v9 }
 0x688   : > { %3568 = shalt.err (!%p3565_p3)
}
 0x689   : > { %s3569_s11 = scalar_lea.hbm %s4144_s26, 384  ;;  %s3573_s15 = scalar_lea.hbm %s4193_s5, 768 }
 0x68a   : > { %p3570_p4 = scmp.ne.s32.totalorder %s4144_s26, %s3569_s11  ;;  %p3574_p9 = scmp.lt.u32.totalorder %s4144_s26, %s4193_s5 }
 0x68b   : > { %p3575_p10 = scmp.lt.u32.totalorder %s3573_s15, %s3569_s11  ;;  %p3577_p12 = scmp.lt.u32.totalorder %s3569_s11, %s4144_s26 }
 0x68c   : > { %p3571_p7 = pnand %p3570_p4, %p3701_p5 }
 0x68d   : > { %p3576_p11 = por %p3575_p10, %p3574_p9 }
 0x68e   : > { %p3572_p8 = pneg %p3571_p7 }
 0x68f   : > { %p3578_p13 = por %p3577_p12, %p3576_p11 }
 0x691   : > { %p3579_p0 = pnand %p3578_p13, %p3572_p8 }
 0x693   : > { %3582 = shalt.err (!%p3579_p0)
}
 0x694   : > { %3493 = dma.vmem_to_hbm [thread:$0]  (%p3701_p5), %s4146_s9, 384, %s4144_s26, %s3183_s22  }
 0x695 PF: > { %p3499_p1 = scmp.ge.s32.totalorder %s3617_s21, 2  ;;  %s3209_s13 = sand.u32 1, %s3605_s18  }
 0x696   : > { %s3210_s8 = scalar_lea.sflag [#allocation3], %s3209_s13 }
 0x697   : > { %p3496_p2 = pnand %p3499_p1, %p3705_p6 }
 0x699   : > { %3600 = dma.done.wait (!%p3496_p2), %s3210_s8, 384  }
 0x69a   : > { %3602 = vsyncadd (!%p3496_p2), %s3210_s8, 4294966912  ;;  %p15_p3 = scmp.ge.s32.totalorder %s3688_s24, 4   ;;  %s4196_s18 = smov %s3609_s19 }
 0x69b   : > { %s4197_s19 = smov %s3613_s20  ;;  %s4198_s20 = smov %s3699_s27 }
 0x69c   : > { %s4199_s21 = smov %s3688_s24  ;;  %17 = sbr.rel (!%p15_p3) target bundleno = 3 (0x3), region = 75 }
 0x6a3   :  { %3215 = vsyncpa [#allocation3], 1 }
 0x6a4   :  { %3217 = vsyncpa [#allocation3 + $0x1], 1 }

</bundles_post_ra>
